<compile_context>
chip_gen: v5e
topology: v5e:2x2
jax: 0.10.0
libtpu: 0.0.40
codegen_flags: <defaults>
</compile_context>

<pallas_src>
import functools

import jax
import jax.numpy as jnp
from jax.experimental import pallas as pl
from jax.experimental.pallas import tpu as pltpu

LANE = 128
SUBLANE = 8


def mlp_kernel(x_ref, w1_ref, b1_ref, w2_ref, b2_ref, w3_ref, b3_ref, o_ref):
    """Fused 3-layer MLP on one batch tile: (Linear+ReLU) x2 -> Linear (lane-padded out)."""
    x = x_ref[...]

    # Layer 0: Linear(32 -> 64) + ReLU   (i=0 < n_hidden_layers=2 -> activation)
    h = jnp.dot(x, w1_ref[...], preferred_element_type=jnp.float32) + b1_ref[...]
    h = jnp.maximum(h, 0.0)

    # Layer 1: Linear(64 -> 64) + ReLU   (i=1 < 2 -> activation)
    h = jnp.dot(h, w2_ref[...], preferred_element_type=jnp.float32) + b2_ref[...]
    h = jnp.maximum(h, 0.0)

    # Layer 2: Linear(64 -> 128-padded), no activation (i=2 is not < 2)
    y = jnp.dot(h, w3_ref[...], preferred_element_type=jnp.float32) + b3_ref[...]

    o_ref[...] = y.astype(o_ref.dtype)


def _round_up(x, m):
    return ((x + m - 1) // m) * m


def mlp_forward(x, params, *, tile_b=1024):
    """params = [(W1, b1), (W2, b2), (W3, b3)] with W_i: [in, out], b_i: [1, out]."""
    (w1, b1), (w2, b2), (w3, b3) = params
    batch, d_in = x.shape
    h1 = w1.shape[1]
    h2 = w2.shape[1]
    n_out = w3.shape[1]

    # ---- Lane-dense output: zero-pad final layer to a multiple of 128 output features. ----
    n_out_p = _round_up(max(n_out, LANE), LANE)
    w3p = jnp.zeros((w3.shape[0], n_out_p), w3.dtype).at[:, :n_out].set(w3)
    b3p = jnp.zeros((1, n_out_p), b3.dtype).at[:, :n_out].set(b3)

    # ---- Batch tiling: pad batch to a multiple of the tile (tile itself multiple of 8). ----
    padded_batch = _round_up(batch, SUBLANE)
    tb = min(_round_up(tile_b, SUBLANE), padded_batch)
    padded_batch = _round_up(padded_batch, tb)
    if padded_batch != batch:
        x = jnp.zeros((padded_batch, d_in), x.dtype).at[:batch].set(x)

    grid = (padded_batch // tb,)

    x_spec = pl.BlockSpec((tb, d_in), lambda i: (i, 0))
    out_spec = pl.BlockSpec((tb, n_out_p), lambda i: (i, 0))
    # Weights/biases: full-array blocks, constant index map -> resident in VMEM across steps.
    resident = lambda arr: pl.BlockSpec(arr.shape, lambda i: (0, 0))

    dt = jnp.dtype(x.dtype).itemsize
    cost = pl.CostEstimate(
        flops=2 * padded_batch * (d_in * h1 + h1 * h2 + h2 * n_out_p),
        transcendentals=0,
        bytes_accessed=(
            padded_batch * (d_in + n_out_p) * dt
            + (w1.size + b1.size + w2.size + b2.size + w3p.size + b3p.size) * dt
        ),
    )

    out_padded = pl.pallas_call(
        mlp_kernel,
        out_shape=jax.ShapeDtypeStruct((padded_batch, n_out_p), jnp.float32),
        grid=grid,
        in_specs=[
            x_spec,
            resident(w1), resident(b1),
            resident(w2), resident(b2),
            resident(w3p), resident(b3p),
        ],
        out_specs=out_spec,
        compiler_params=pltpu.CompilerParams(dimension_semantics=("parallel",)),
        cost_estimate=cost,
    )(x, w1, b1, w2, b2, w3p, b3p)

    return out_padded[:batch, :n_out]


def init_params(key, n_neurons):
    """Deterministic init mimicking torch.nn.Linear (uniform +-1/sqrt(fan_in))."""
    params = []
    for i in range(len(n_neurons) - 1):
        fan_in, fan_out = n_neurons[i], n_neurons[i + 1]
        key, kw, kb = jax.random.split(key, 3)
        bound = 1.0 / jnp.sqrt(float(fan_in))
        w = jax.random.uniform(kw, (fan_in, fan_out), jnp.float32, -bound, bound)
        b = jax.random.uniform(kb, (1, fan_out), jnp.float32, -bound, bound)
        params.append((w, b))
    return params


def mlp_reference(x, params, n_hidden_layers):
    """Pure-JAX reference matching the PyTorch forward semantics."""
    h = x
    for i, (w, b) in enumerate(params):
        h = h @ w + b
        if i < n_hidden_layers:
            h = jnp.maximum(h, 0.0)
    return h


if __name__ == "__main__":
    n_hidden_layers = 2
    n_neurons = [32, 64, 64, 4]
    batch = 2

    key = jax.random.PRNGKey(0)
    key, kx = jax.random.split(key)
    x = jax.random.normal(kx, (batch, n_neurons[0]), dtype=jnp.float32)

    params = init_params(key, n_neurons)

    fwd = jax.jit(functools.partial(mlp_forward, tile_b=1024))
    out = fwd(x, params)
    jax.block_until_ready(out)

    ref = mlp_reference(x, params, n_hidden_layers)
    assert out.shape == (batch, n_neurons[-1])
    assert jnp.allclose(out, ref, atol=1e-4, rtol=1e-4), "mismatch vs reference"

    # Also exercise a batch that actually spans multiple grid steps (2 tiles of 1024).
    key, kb = jax.random.split(key)
    xb = jax.random.normal(kb, (2048 + 5, n_neurons[0]), dtype=jnp.float32)
    outb = fwd(xb, params)
    jax.block_until_ready(outb)
    refb = mlp_reference(xb, params, n_hidden_layers)
    assert outb.shape == (xb.shape[0], n_neurons[-1])
    assert jnp.allclose(outb, refb, atol=1e-4, rtol=1e-4), "mismatch vs reference (large batch)"

    print("KERNEL_OK")
</pallas_src>

<mosaic_0001>
module attributes {stable_mosaic.version = 11 : i64} {
  func.func @mlp_kernel(%arg0: i32, %arg1: memref<8x32xf32, #tpu.memory_space<vmem>>, %arg2: memref<32x64xf32, #tpu.memory_space<vmem>>, %arg3: memref<1x64xf32, #tpu.memory_space<vmem>>, %arg4: memref<64x64xf32, #tpu.memory_space<vmem>>, %arg5: memref<1x64xf32, #tpu.memory_space<vmem>>, %arg6: memref<64x128xf32, #tpu.memory_space<vmem>>, %arg7: memref<1x128xf32, #tpu.memory_space<vmem>>, %arg8: memref<8x128xf32, #tpu.memory_space<vmem>>) attributes {dimension_semantics = [#tpu.dimension_semantics<parallel>], iteration_bounds = array<i64: 1>, scalar_prefetch = 0 : i64, scratch_operands = 0 : i64, tpu.core_type = #tpu.core_type<tc>, window_params = [{transform_indices = @transform_0, window_bounds = array<i64: 8, 32>}, {pipeline_mode = #tpu.pipeline_mode<synchronous>, transform_indices = @transform_1, window_bounds = array<i64: 32, 64>}, {pipeline_mode = #tpu.pipeline_mode<synchronous>, transform_indices = @transform_2, window_bounds = array<i64: 1, 64>}, {pipeline_mode = #tpu.pipeline_mode<synchronous>, transform_indices = @transform_3, window_bounds = array<i64: 64, 64>}, {pipeline_mode = #tpu.pipeline_mode<synchronous>, transform_indices = @transform_4, window_bounds = array<i64: 1, 64>}, {pipeline_mode = #tpu.pipeline_mode<synchronous>, transform_indices = @transform_5, window_bounds = array<i64: 64, 128>}, {pipeline_mode = #tpu.pipeline_mode<synchronous>, transform_indices = @transform_6, window_bounds = array<i64: 1, 128>}, {transform_indices = @transform_7, window_bounds = array<i64: 8, 128>}]} {
    %c0 = arith.constant 0 : index
    %c0_0 = arith.constant 0 : index
    %0 = vector.load %arg1[%c0, %c0_0] : memref<8x32xf32, #tpu.memory_space<vmem>>, vector<8x32xf32>
    %c0_1 = arith.constant 0 : index
    %c0_2 = arith.constant 0 : index
    %1 = vector.load %arg2[%c0_1, %c0_2] : memref<32x64xf32, #tpu.memory_space<vmem>>, vector<32x64xf32>
    %cst = arith.constant dense<0.000000e+00> : vector<8x64xf32>
    %2 = tpu.matmul %0, %1, %cst {dimension_numbers = #tpu.dot_dimension_numbers<[1], [0], [0], [1], [0, 0, 1, 1], [], []>} : vector<8x32xf32>, vector<32x64xf32>, vector<8x64xf32> -> vector<8x64xf32>
    %c0_3 = arith.constant 0 : index
    %c0_4 = arith.constant 0 : index
    %3 = vector.load %arg3[%c0_3, %c0_4] : memref<1x64xf32, #tpu.memory_space<vmem>>, vector<1x64xf32>
    %4 = vector.broadcast %3 : vector<1x64xf32> to vector<8x64xf32>
    %5 = arith.addf %2, %4 : vector<8x64xf32>
    %cst_5 = arith.constant 0.000000e+00 : f32
    %6 = vector.broadcast %cst_5 : f32 to vector<8x64xf32>
    %7 = arith.maximumf %5, %6 : vector<8x64xf32>
    %c0_6 = arith.constant 0 : index
    %c0_7 = arith.constant 0 : index
    %8 = vector.load %arg4[%c0_6, %c0_7] : memref<64x64xf32, #tpu.memory_space<vmem>>, vector<64x64xf32>
    %cst_8 = arith.constant dense<0.000000e+00> : vector<8x64xf32>
    %9 = tpu.matmul %7, %8, %cst_8 {dimension_numbers = #tpu.dot_dimension_numbers<[1], [0], [0], [1], [0, 0, 1, 1], [], []>} : vector<8x64xf32>, vector<64x64xf32>, vector<8x64xf32> -> vector<8x64xf32>
    %c0_9 = arith.constant 0 : index
    %c0_10 = arith.constant 0 : index
    %10 = vector.load %arg5[%c0_9, %c0_10] : memref<1x64xf32, #tpu.memory_space<vmem>>, vector<1x64xf32>
    %11 = vector.broadcast %10 : vector<1x64xf32> to vector<8x64xf32>
    %12 = arith.addf %9, %11 : vector<8x64xf32>
    %cst_11 = arith.constant 0.000000e+00 : f32
    %13 = vector.broadcast %cst_11 : f32 to vector<8x64xf32>
    %14 = arith.maximumf %12, %13 : vector<8x64xf32>
    %c0_12 = arith.constant 0 : index
    %c0_13 = arith.constant 0 : index
    %15 = vector.load %arg6[%c0_12, %c0_13] : memref<64x128xf32, #tpu.memory_space<vmem>>, vector<64x128xf32>
    %cst_14 = arith.constant dense<0.000000e+00> : vector<8x128xf32>
    %16 = tpu.matmul %14, %15, %cst_14 {dimension_numbers = #tpu.dot_dimension_numbers<[1], [0], [0], [1], [0, 0, 1, 1], [], []>} : vector<8x64xf32>, vector<64x128xf32>, vector<8x128xf32> -> vector<8x128xf32>
    %c0_15 = arith.constant 0 : index
    %c0_16 = arith.constant 0 : index
    %17 = vector.load %arg7[%c0_15, %c0_16] : memref<1x128xf32, #tpu.memory_space<vmem>>, vector<1x128xf32>
    %18 = vector.broadcast %17 : vector<1x128xf32> to vector<8x128xf32>
    %19 = arith.addf %16, %18 : vector<8x128xf32>
    %c0_17 = arith.constant 0 : index
    %c0_18 = arith.constant 0 : index
    %20 = vector.load %arg8[%c0_17, %c0_18] : memref<8x128xf32, #tpu.memory_space<vmem>>, vector<8x128xf32>
    tpu.vector_store %arg8[%c0_17, %c0_18], %19 {strides = array<i32>} : memref<8x128xf32, #tpu.memory_space<vmem>>, vector<8x128xf32>,
    return
  }
  func.func @transform_0(%arg0: i32) -> (i32, i32) {
    %c0_i32 = arith.constant 0 : i32
    %c0_i32_0 = arith.constant 0 : i32
    return %arg0, %c0_i32 : i32, i32
  }
  func.func @transform_1(%arg0: i32) -> (i32, i32) {
    %c0_i32 = arith.constant 0 : i32
    %c0_i32_0 = arith.constant 0 : i32
    %c0_i32_1 = arith.constant 0 : i32
    return %c0_i32, %c0_i32_0 : i32, i32
  }
  func.func @transform_2(%arg0: i32) -> (i32, i32) {
    %c0_i32 = arith.constant 0 : i32
    %c0_i32_0 = arith.constant 0 : i32
    %c0_i32_1 = arith.constant 0 : i32
    return %c0_i32, %c0_i32_0 : i32, i32
  }
  func.func @transform_3(%arg0: i32) -> (i32, i32) {
    %c0_i32 = arith.constant 0 : i32
    %c0_i32_0 = arith.constant 0 : i32
    %c0_i32_1 = arith.constant 0 : i32
    return %c0_i32, %c0_i32_0 : i32, i32
  }
  func.func @transform_4(%arg0: i32) -> (i32, i32) {
    %c0_i32 = arith.constant 0 : i32
    %c0_i32_0 = arith.constant 0 : i32
    %c0_i32_1 = arith.constant 0 : i32
    return %c0_i32, %c0_i32_0 : i32, i32
  }
  func.func @transform_5(%arg0: i32) -> (i32, i32) {
    %c0_i32 = arith.constant 0 : i32
    %c0_i32_0 = arith.constant 0 : i32
    %c0_i32_1 = arith.constant 0 : i32
    return %c0_i32, %c0_i32_0 : i32, i32
  }
  func.func @transform_6(%arg0: i32) -> (i32, i32) {
    %c0_i32 = arith.constant 0 : i32
    %c0_i32_0 = arith.constant 0 : i32
    %c0_i32_1 = arith.constant 0 : i32
    return %c0_i32, %c0_i32_0 : i32, i32
  }
  func.func @transform_7(%arg0: i32) -> (i32, i32) {
    %c0_i32 = arith.constant 0 : i32
    %c0_i32_0 = arith.constant 0 : i32
    return %arg0, %c0_i32 : i32, i32
  }
}

</mosaic_0001>

<bundles_post_ra>
// kernel: mlp_forward.1
= control target key start
LH: loop header
LB: loop body
LE: loop exit
PB: predicated region body
PF: predicated region fallthrough
CT: control target
= control target key end

     0   :  { %vm35_vm0 = vcmask 261120   ;;  %vm72_vm1 = vcmask 523264   ;;  %s258_s1 = inlined_call_operand.vmem [shape: f32[32,64], index: 1, kind: input, shape index: {}]   ;;  %s259_s3 = inlined_call_operand.vmem [shape: f32[64,64], index: 3, kind: input, shape index: {}]   ;;  %s260_s0 = inlined_call_operand.vmem [shape: f32[8,32], index: 0, kind: input, shape index: {}]   ;;  %s261_s2 = inlined_call_operand.vmem [shape: f32[1,64], index: 2, kind: input, shape index: {}]   ;;  %s262_s4 = inlined_call_operand.vmem [shape: f32[1,64], index: 4, kind: input, shape index: {}]   ;;  %s263_s5 = inlined_call_operand.vmem [shape: f32[64,128], index: 5, kind: input, shape index: {}]   ;;  %s264_s6 = inlined_call_operand.vmem [shape: f32[1,128], index: 6, kind: input, shape index: {}]   ;;  %s265_s7 = inlined_call_operand.vmem [shape: f32[8,128], index: 7, kind: output, shape index: {}]  }
   0x1   :  { %v30_v0 = vld [vmem:[%s258_s1 + $0x18] sm:$0xff]  ;;  %v29_v1 = vld [vmem:[%s258_s1 + $0x10] sm:$0xff]  ;;  %v28_v3 = vld [vmem:[%s258_s1 + $0x8] sm:$0xff] }
   0x2   :  { %51 = vmatpush.msra.mxu0 %v30_v0  ;;  %v67_v2 = vld [vmem:[%s259_s3 + $0x38] sm:$0xff]  ;;  %v66_v4 = vld [vmem:[%s259_s3 + $0x30] sm:$0xff]  ;;  %v65_v5 = vld [vmem:[%s259_s3 + $0x28] sm:$0xff] }
   0x3   :  { %84 = vmatpush.msra.mxu1 %v67_v2  ;;  %v27_v6 = vld [vmem:[%s258_s1] sm:$0xff]  ;;  %v63_v9 = vld [vmem:[%s259_s3 + $0x18] sm:$0xff]  ;;  %v62_v10 = vld [vmem:[%s259_s3 + $0x10] sm:$0xff] }
   0x4   :  { %52 = vmatpush.msra.mxu0 %v29_v1  ;;  %v26_v7 = vld [vmem:[%s260_s0] sm:$0xff]  ;;  %v61_v11 = vld [vmem:[%s259_s3 + $0x8] sm:$0xff]  ;;  %v104_v13 = vld [vmem:[%s263_s5 + $0x38] sm:$0xff] }
   0x5   :  { %85 = vmatpush.msra.mxu1 %v66_v4  ;;  %v64_v8 = vld [vmem:[%s259_s3 + $0x20] sm:$0xff]  ;;  %v103_v14 = vld [vmem:[%s263_s5 + $0x30] sm:$0xff]  ;;  %120 = vmatpush.msra.mxu2 %v104_v13  ;;  %v102_v15 = vld [vmem:[%s263_s5 + $0x28] sm:$0xff] }
   0x6   :  { %53 = vmatpush.msra.mxu0 %v28_v3  ;;  %v60_v12 = vld [vmem:[%s259_s3] sm:$0xff]  ;;  %v100_v17 = vld [vmem:[%s263_s5 + $0x18] sm:$0xff]  ;;  %v99_v22 = vld [vmem:[%s263_s5 + $0x10] sm:$0xff] }
   0x7   :  { %86 = vmatpush.msra.mxu1 %v65_v5  ;;  %121 = vmatpush.msra.mxu2 %v103_v14  ;;  %v101_v16 = vld [vmem:[%s263_s5 + $0x20] sm:$0xff]  ;;  %v98_v23 = vld [vmem:[%s263_s5 + $0x8] sm:$0xff] }
   0x8   :  { %54 = vmatpush.msra.mxu0 %v27_v6  ;;  %v140_v18 = vld [vmem:[%s261_s2] ss:$0 sm:$0xff] }
   0x9   :  { %137 = vmatmul.msk.f32.vlgmr.msra.gmra.mxu0 %vm35_vm0, %v26_v7  ;;  %87 = vmatpush.msra.mxu1 %v64_v8  ;;  %v97_v24 = vld [vmem:[%s263_s5] sm:$0xff] }
   0xa   :  { %122 = vmatpush.msra.mxu2 %v102_v15  ;;  %v141_v25 = vld [vmem:[%s262_s4] ss:$0 sm:$0xff] }
   0xb   :  { %88 = vmatpush.msra.mxu1 %v63_v9  ;;  %v142_v29 = vld [vmem:[%s264_s6] ss:$0 sm:$0xff] }
   0xc   :  { %123 = vmatpush.msra.mxu2 %v101_v16 }
   0xd   :  { %89 = vmatpush.msra.mxu1 %v62_v10 }
   0xe   :  { %124 = vmatpush.msra.mxu2 %v100_v17 }
   0xf   :  { %90 = vmatpush.msra.mxu1 %v61_v11 }
  0x10   :  { %125 = vmatpush.msra.mxu2 %v99_v22 }
  0x11   :  { %91 = vmatpush.msra.mxu1 %v60_v12 }
  0x12   :  { %126 = vmatpush.msra.mxu2 %v98_v23 }
  0x14   :  { %127 = vmatpush.msra.mxu2 %v97_v24 }
  0x86   :  { %v56_v19 = vpop.f32.mrf.mxu0 }
  0x87   :  { %v57_v20 = vadd.f32 %v140_v18, %v56_v19 }
  0x89   :  { %v59_v21 = vmax.f32 %v57_v20, 0.0 }
  0x8b   :  { %138 = vmatmul.msk.f32.vlgmr.msra.gmra.mxu1 %vm72_vm1, %v59_v21 }
 0x108   :  { %v93_v26 = vpop.f32.mrf.mxu1 }
 0x109   :  { %v94_v27 = vadd.f32 %v141_v25, %v93_v26 }
 0x10b   :  { %v96_v28 = vmax.f32 %v94_v27, 0.0 }
 0x10d   :  { %139 = vmatmul.msk.f32.vlgmr.msra.gmra.mxu2 %vm72_vm1, %v96_v28 }
 0x190   :  { %v129_v30 = vpop.f32.mrf.mxu2 }
 0x191   :  { %v130_v31 = vadd.f32 %v142_v29, %v129_v30 }
 0x193   :  { %132 = vst [vmem:[%s265_s7] sm:$0xff] %v130_v31 }

</bundles_post_ra>
